<compile_context>
chip_gen: v7x
topology: tpu7x:2x2x1
jax: 0.10.0
libtpu: 0.0.40
codegen_flags: <defaults>
</compile_context>

<pallas_src>
import numpy as np
import jax
import jax.numpy as jnp
from jax.experimental import pallas as pl
from jax.experimental.pallas import tpu as pltpu

FIELD_SIZE = 8  # fixed in FIN_b.__init__


# --------------------------------------------------------------------------- #
# Kernel
# --------------------------------------------------------------------------- #
def fin_b_kernel(x_ref,        # (bN, ndf+ncf)   concat([discrete_x, continous_x])
                 wemb_ref,     # (ndf+ncf, nh0)  fused embedding_d + CEmbedding weight
                 bemb_ref,     # (1, nh0)
                 vb_ref,       # (nh0, channel*emb)      banded FM factors
                 vb2_ref,      # (nh0, channel*emb)      banded squared FM factors
                 wlb_ref,      # (nh0, channel)          banded lin(field_size,1) weight
                 g_ref,        # (channel*emb, channel)  per-channel group-sum matrix
                 wp1x_ref,     # (nh0, hidden)
                 wp1f_ref,     # (channel, hidden)
                 bp1_ref,      # (1, hidden)   (lin bias bl already folded in)
                 wp2_ref,      # (hidden, 1)
                 bp2_ref,      # (1,) scalar in SMEM
                 out_ref):     # (bN, 1)
    # ---- fused embeddings: relu([xd | xc] @ W_emb + b_emb) -------------------
    # TODO(synk): CEmbedding / activation sources not provided; reconstructed as
    # per-feature value embedding + ReLU (flattened width ncf*ncc == 2*ncc).
    x = jnp.dot(x_ref[...], wemb_ref[...],
                preferred_element_type=jnp.float32) + bemb_ref[...]
    x = jnp.maximum(x, 0.0)                                           # (bN, nh0)

    # ---- unfold windows + lin + FactorizationMachine as banded matmuls -------
    s = jnp.dot(x, vb_ref[...], preferred_element_type=jnp.float32)        # sum_f x*v
    ss = jnp.dot(x * x, vb2_ref[...], preferred_element_type=jnp.float32)  # sum_f (x*v)^2
    lin = jnp.dot(x, wlb_ref[...], preferred_element_type=jnp.float32)     # (bN, C)
    fm = 0.5 * jnp.dot(s * s - ss, g_ref[...],
                       preferred_element_type=jnp.float32)                 # (bN, C)
    x_fm = lin + fm                                                   # (bN, channel)

    # ---- prediction head (split weights -> no lane concatenate) --------------
    # TODO(synk): PredictionLayer source not provided; reconstructed as
    # Linear -> leaky_relu(0.01) -> Linear(.,1); dropout/batchnorm are inference no-ops.
    h = (jnp.dot(x, wp1x_ref[...], preferred_element_type=jnp.float32)
         + jnp.dot(x_fm, wp1f_ref[...], preferred_element_type=jnp.float32)
         + bp1_ref[...])
    h = jnp.where(h > 0, h, 0.01 * h)
    logit = jnp.dot(h, wp2_ref[...],
                    preferred_element_type=jnp.float32) + bp2_ref[0]       # (bN, 1)
    out_ref[...] = jax.nn.sigmoid(logit)


# --------------------------------------------------------------------------- #
# Wrapper
# --------------------------------------------------------------------------- #
def _round_up(x, m):
    return ((x + m - 1) // m) * m


def fin_b_forward(discrete_x, continous_x, packed, n_users, block_n=512):
    xd = discrete_x[:n_users].astype(jnp.float32)
    xc = continous_x[:n_users].astype(jnp.float32)
    x_in = jnp.concatenate([xd, xc], axis=-1)          # (N, ndf+ncf)
    N, d_in = x_in.shape

    # row tile: multiple of the f32 sublane (8); sized well under VMEM even on v7x.
    block_n = min(block_n, _round_up(N, 8))
    padded_n = _round_up(N, block_n)
    if padded_n != N:
        x_in = jnp.pad(x_in, ((0, padded_n - N), (0, 0)))

    weights = (packed["W_emb"], packed["b_emb"], packed["Vb"], packed["Vb2"],
               packed["WLb"], packed["G"], packed["wp1_x"], packed["wp1_fm"],
               packed["bp1"], packed["wp2"])
    bp2 = packed["bp2"]

    def _full(a):  # full-extent, VMEM-resident weight block
        return pl.BlockSpec(a.shape, lambda i: (0, 0))

    out = pl.pallas_call(
        fin_b_kernel,
        out_shape=jax.ShapeDtypeStruct((padded_n, 1), jnp.float32),
        grid=(padded_n // block_n,),
        in_specs=[pl.BlockSpec((block_n, d_in), lambda i: (i, 0))]
                 + [_full(w) for w in weights]
                 + [pl.BlockSpec(memory_space=pltpu.MemorySpace.SMEM)],
        out_specs=pl.BlockSpec((block_n, 1), lambda i: (i, 0)),
        compiler_params=pltpu.CompilerParams(
            dimension_semantics=("parallel",)),
    )(x_in, *weights, bp2)
    return out[:N]


# --------------------------------------------------------------------------- #
# Parameters
# --------------------------------------------------------------------------- #
def make_params(key, ndf, ncf, ncc, n_emb):
    """Raw module-style parameters in math orientation (y = x @ W + b).

    NOTE: PyTorch nn.Linear stores weight as (out, in) and computes x @ W.T;
    real checkpoints must be transposed (wd/wp1/wp2), and v reshaped from
    (1, channel, field, emb) to (channel, field, emb) before pack_params.
    """
    nh0 = ndf + ncf * ncc            # == ndf + 2*ncc for ncf == 2 (module's nh0)
    channel = nh0 - FIELD_SIZE + 1
    hidden = (nh0 + channel) // 2
    ks = jax.random.split(key, 8)

    def glorot(k, shape):
        fan_in, fan_out = shape[-2], shape[-1]
        lim = jnp.sqrt(6.0 / (fan_in + fan_out))
        return jax.random.uniform(k, shape, jnp.float32, -lim, lim)

    return {
        "wd": glorot(ks[0], (ndf, ndf)),
        "bd": jnp.zeros((ndf,), jnp.float32),
        "wce": glorot(ks[1], (ncf, ncc)),
        "bce": 0.01 * jax.random.normal(ks[2], (ncf, ncc), jnp.float32),
        "v": glorot(ks[3], (channel, FIELD_SIZE, n_emb)),
        "wl": glorot(ks[4], (FIELD_SIZE, 1))[:, 0],
        "bl": jnp.zeros((), jnp.float32),
        "wp1": glorot(ks[5], (nh0 + channel, hidden)),
        "bp1": jnp.zeros((hidden,), jnp.float32),
        "wp2": glorot(ks[6], (hidden, 1)),
        "bp2": jnp.zeros((), jnp.float32),
    }


def pack_params(params, ndf, ncf, ncc, n_emb):
    """Host-side precompute of the fused / banded weight matrices."""
    nh0 = ndf + ncf * ncc
    channel = nh0 - FIELD_SIZE + 1
    d_in = ndf + ncf

    wd = np.asarray(params["wd"]); bd = np.asarray(params["bd"])
    wce = np.asarray(params["wce"]); bce = np.asarray(params["bce"])
    v = np.asarray(params["v"])                           # (channel, field, emb)
    wl = np.asarray(params["wl"]); bl = float(params["bl"])
    wp1 = np.asarray(params["wp1"]); bp1 = np.asarray(params["bp1"])
    wp2 = np.asarray(params["wp2"]); bp2 = float(params["bp2"])

    # Fused embedding block weight: [xd|xc] @ W_emb + b_emb == [x_d | x_c] (pre-ReLU).
    W_emb = np.zeros((d_in, nh0), np.float32)
    W_emb[:ndf, :ndf] = wd
    for i in range(ncf):
        W_emb[ndf + i, ndf + i * ncc: ndf + (i + 1) * ncc] = wce[i]
    b_emb = np.concatenate([bd, bce.reshape(-1)]).reshape(1, nh0).astype(np.float32)

    # Banded FM / lin weights: Vb[c+f, c*E+e] = v[c,f,e], WLb[c+f, c] = wl[f],
    # G[c*E+e, c] = 1  (group-sum over the embedding dim, stays lane-dense 2-D).
    Vb = np.zeros((nh0, channel * n_emb), np.float32)
    Vb2 = np.zeros((nh0, channel * n_emb), np.float32)
    WLb = np.zeros((nh0, channel), np.float32)
    G = np.zeros((channel * n_emb, channel), np.float32)
    for c in range(channel):
        Vb[c:c + FIELD_SIZE, c * n_emb:(c + 1) * n_emb] = v[c]
        Vb2[c:c + FIELD_SIZE, c * n_emb:(c + 1) * n_emb] = v[c] * v[c]
        WLb[c:c + FIELD_SIZE, c] = wl
        G[c * n_emb:(c + 1) * n_emb, c] = 1.0

    # Split prediction weight (no in-kernel concat) and fold the lin bias bl.
    wp1_x = wp1[:nh0].astype(np.float32)
    wp1_fm = wp1[nh0:].astype(np.float32)
    bp1_eff = (bp1 + bl * wp1_fm.sum(axis=0)).reshape(1, -1).astype(np.float32)

    return {
        "W_emb": jnp.asarray(W_emb), "b_emb": jnp.asarray(b_emb),
        "Vb": jnp.asarray(Vb), "Vb2": jnp.asarray(Vb2),
        "WLb": jnp.asarray(WLb), "G": jnp.asarray(G),
        "wp1_x": jnp.asarray(wp1_x), "wp1_fm": jnp.asarray(wp1_fm),
        "bp1": jnp.asarray(bp1_eff),
        "wp2": jnp.asarray(wp2.astype(np.float32)),
        "bp2": jnp.asarray(np.array([bp2], np.float32)),
    }


# --------------------------------------------------------------------------- #
# Pure-JAX reference (original unfold / FM formulation) for a numerics check
# --------------------------------------------------------------------------- #
def fin_b_reference(discrete_x, continous_x, params, n_users, ndf, ncf, ncc, n_emb):
    xd = discrete_x[:n_users]
    xc = continous_x[:n_users]
    nh0 = ndf + ncf * ncc
    channel = nh0 - FIELD_SIZE + 1

    x_d = jnp.maximum(xd @ params["wd"] + params["bd"], 0.0)
    parts = [xc[:, i:i + 1] * params["wce"][i] + params["bce"][i] for i in range(ncf)]
    x_c = jnp.maximum(jnp.concatenate(parts, axis=-1), 0.0)
    x = jnp.concatenate([x_d, x_c], axis=-1)                          # (N, nh0)

    win = jnp.stack([x[:, c:c + FIELD_SIZE] for c in range(channel)], axis=1)  # (N,C,F)
    xv = win[..., None] * params["v"][None]                           # (N, C, F, E)
    fm = 0.5 * jnp.sum(jnp.sum(xv, axis=-2) ** 2 - jnp.sum(xv ** 2, axis=-2), axis=-1)
    lin = win @ params["wl"] + params["bl"]
    x_fm = lin + fm

    res = jnp.concatenate([x, x_fm], axis=-1)
    h = res @ params["wp1"] + params["bp1"]
    h = jnp.where(h > 0, h, 0.01 * h)
    logit = h @ params["wp2"] + params["bp2"]
    return jax.nn.sigmoid(logit)


if __name__ == "__main__":
    # small, forward-consistent config:
    #   n_discrete_features = 16, n_continous_features = 2, n_channels_c = 8,
    #   n_embedding = 4, num_targets (n_users) = 8
    ndf, ncf, ncc, n_emb = 16, 2, 8, 4
    n_users, n_total_nodes = 8, 12

    key = jax.random.PRNGKey(0)
    k_d, k_c, k_p = jax.random.split(key, 3)
    discrete_x = jax.random.normal(k_d, (n_total_nodes, ndf), jnp.float32)
    continous_x = jax.random.normal(k_c, (n_total_nodes, ncf), jnp.float32)

    params = make_params(k_p, ndf, ncf, ncc, n_emb)
    packed = pack_params(params, ndf, ncf, ncc, n_emb)

    out = fin_b_forward(discrete_x, continous_x, packed, n_users)
    out = jax.block_until_ready(out)

    ref = fin_b_reference(discrete_x, continous_x, params, n_users, ndf, ncf, ncc, n_emb)
    ref = jax.block_until_ready(ref)

    assert out.shape == (n_users, 1), out.shape
    assert bool(jnp.all((out >= 0.0) & (out <= 1.0)))
    assert bool(jnp.allclose(out, ref, atol=2e-3, rtol=2e-3)), (out, ref)
    print("KERNEL_OK")
</pallas_src>

<mosaic_0001>
module attributes {stable_mosaic.version = 11 : i64} {
  func.func @fin_b_kernel(%arg0: i32, %arg1: memref<8x18xf32, #tpu.memory_space<vmem>>, %arg2: memref<18x32xf32, #tpu.memory_space<vmem>>, %arg3: memref<1x32xf32, #tpu.memory_space<vmem>>, %arg4: memref<32x100xf32, #tpu.memory_space<vmem>>, %arg5: memref<32x100xf32, #tpu.memory_space<vmem>>, %arg6: memref<32x25xf32, #tpu.memory_space<vmem>>, %arg7: memref<100x25xf32, #tpu.memory_space<vmem>>, %arg8: memref<32x28xf32, #tpu.memory_space<vmem>>, %arg9: memref<25x28xf32, #tpu.memory_space<vmem>>, %arg10: memref<1x28xf32, #tpu.memory_space<vmem>>, %arg11: memref<28x1xf32, #tpu.memory_space<vmem>>, %arg12: memref<1xf32, #tpu.memory_space<smem>>, %arg13: memref<8x1xf32, #tpu.memory_space<vmem>>) attributes {dimension_semantics = [#tpu.dimension_semantics<parallel>], iteration_bounds = array<i64: 1>, scalar_prefetch = 0 : i64, scratch_operands = 0 : i64, tpu.core_type = #tpu.core_type<tc>, window_params = [{transform_indices = @transform_0, window_bounds = array<i64: 8, 18>}, {pipeline_mode = #tpu.pipeline_mode<synchronous>, transform_indices = @transform_1, window_bounds = array<i64: 18, 32>}, {pipeline_mode = #tpu.pipeline_mode<synchronous>, transform_indices = @transform_2, window_bounds = array<i64: 1, 32>}, {pipeline_mode = #tpu.pipeline_mode<synchronous>, transform_indices = @transform_3, window_bounds = array<i64: 32, 100>}, {pipeline_mode = #tpu.pipeline_mode<synchronous>, transform_indices = @transform_4, window_bounds = array<i64: 32, 100>}, {pipeline_mode = #tpu.pipeline_mode<synchronous>, transform_indices = @transform_5, window_bounds = array<i64: 32, 25>}, {pipeline_mode = #tpu.pipeline_mode<synchronous>, transform_indices = @transform_6, window_bounds = array<i64: 100, 25>}, {pipeline_mode = #tpu.pipeline_mode<synchronous>, transform_indices = @transform_7, window_bounds = array<i64: 32, 28>}, {pipeline_mode = #tpu.pipeline_mode<synchronous>, transform_indices = @transform_8, window_bounds = array<i64: 25, 28>}, {pipeline_mode = #tpu.pipeline_mode<synchronous>, transform_indices = @transform_9, window_bounds = array<i64: 1, 28>}, {pipeline_mode = #tpu.pipeline_mode<synchronous>, transform_indices = @transform_10, window_bounds = array<i64: 28, 1>}, {transform_indices = @transform_11, window_bounds = array<i64: 1>}, {transform_indices = @transform_12, window_bounds = array<i64: 8, 1>}]} {
    %c0 = arith.constant 0 : index
    %c0_0 = arith.constant 0 : index
    %0 = vector.load %arg1[%c0, %c0_0] : memref<8x18xf32, #tpu.memory_space<vmem>>, vector<8x18xf32>
    %c0_1 = arith.constant 0 : index
    %c0_2 = arith.constant 0 : index
    %1 = vector.load %arg2[%c0_1, %c0_2] : memref<18x32xf32, #tpu.memory_space<vmem>>, vector<18x32xf32>
    %cst = arith.constant dense<0.000000e+00> : vector<8x32xf32>
    %2 = tpu.matmul %0, %1, %cst {dimension_numbers = #tpu.dot_dimension_numbers<[1], [0], [0], [1], [0, 0, 1, 1], [], []>} : vector<8x18xf32>, vector<18x32xf32>, vector<8x32xf32> -> vector<8x32xf32>
    %c0_3 = arith.constant 0 : index
    %c0_4 = arith.constant 0 : index
    %3 = vector.load %arg3[%c0_3, %c0_4] : memref<1x32xf32, #tpu.memory_space<vmem>>, vector<1x32xf32>
    %4 = vector.broadcast %3 : vector<1x32xf32> to vector<8x32xf32>
    %5 = arith.addf %2, %4 : vector<8x32xf32>
    %cst_5 = arith.constant 0.000000e+00 : f32
    %6 = vector.broadcast %cst_5 : f32 to vector<8x32xf32>
    %7 = arith.maximumf %5, %6 : vector<8x32xf32>
    %c0_6 = arith.constant 0 : index
    %c0_7 = arith.constant 0 : index
    %8 = vector.load %arg4[%c0_6, %c0_7] : memref<32x100xf32, #tpu.memory_space<vmem>>, vector<32x100xf32>
    %cst_8 = arith.constant dense<0.000000e+00> : vector<8x100xf32>
    %9 = tpu.matmul %7, %8, %cst_8 {dimension_numbers = #tpu.dot_dimension_numbers<[1], [0], [0], [1], [0, 0, 1, 1], [], []>} : vector<8x32xf32>, vector<32x100xf32>, vector<8x100xf32> -> vector<8x100xf32>
    %10 = arith.mulf %7, %7 : vector<8x32xf32>
    %c0_9 = arith.constant 0 : index
    %c0_10 = arith.constant 0 : index
    %11 = vector.load %arg5[%c0_9, %c0_10] : memref<32x100xf32, #tpu.memory_space<vmem>>, vector<32x100xf32>
    %cst_11 = arith.constant dense<0.000000e+00> : vector<8x100xf32>
    %12 = tpu.matmul %10, %11, %cst_11 {dimension_numbers = #tpu.dot_dimension_numbers<[1], [0], [0], [1], [0, 0, 1, 1], [], []>} : vector<8x32xf32>, vector<32x100xf32>, vector<8x100xf32> -> vector<8x100xf32>
    %c0_12 = arith.constant 0 : index
    %c0_13 = arith.constant 0 : index
    %13 = vector.load %arg6[%c0_12, %c0_13] : memref<32x25xf32, #tpu.memory_space<vmem>>, vector<32x25xf32>
    %cst_14 = arith.constant dense<0.000000e+00> : vector<8x25xf32>
    %14 = tpu.matmul %7, %13, %cst_14 {dimension_numbers = #tpu.dot_dimension_numbers<[1], [0], [0], [1], [0, 0, 1, 1], [], []>} : vector<8x32xf32>, vector<32x25xf32>, vector<8x25xf32> -> vector<8x25xf32>
    %15 = arith.mulf %9, %9 : vector<8x100xf32>
    %16 = arith.subf %15, %12 : vector<8x100xf32>
    %c0_15 = arith.constant 0 : index
    %c0_16 = arith.constant 0 : index
    %17 = vector.load %arg7[%c0_15, %c0_16] : memref<100x25xf32, #tpu.memory_space<vmem>>, vector<100x25xf32>
    %cst_17 = arith.constant dense<0.000000e+00> : vector<8x25xf32>
    %18 = tpu.matmul %16, %17, %cst_17 {dimension_numbers = #tpu.dot_dimension_numbers<[1], [0], [0], [1], [0, 0, 1, 1], [], []>} : vector<8x100xf32>, vector<100x25xf32>, vector<8x25xf32> -> vector<8x25xf32>
    %cst_18 = arith.constant 5.000000e-01 : f32
    %19 = vector.broadcast %cst_18 : f32 to vector<8x25xf32>
    %20 = arith.mulf %19, %18 : vector<8x25xf32>
    %21 = arith.addf %14, %20 : vector<8x25xf32>
    %c0_19 = arith.constant 0 : index
    %c0_20 = arith.constant 0 : index
    %22 = vector.load %arg8[%c0_19, %c0_20] : memref<32x28xf32, #tpu.memory_space<vmem>>, vector<32x28xf32>
    %cst_21 = arith.constant dense<0.000000e+00> : vector<8x28xf32>
    %23 = tpu.matmul %7, %22, %cst_21 {dimension_numbers = #tpu.dot_dimension_numbers<[1], [0], [0], [1], [0, 0, 1, 1], [], []>} : vector<8x32xf32>, vector<32x28xf32>, vector<8x28xf32> -> vector<8x28xf32>
    %c0_22 = arith.constant 0 : index
    %c0_23 = arith.constant 0 : index
    %24 = vector.load %arg9[%c0_22, %c0_23] : memref<25x28xf32, #tpu.memory_space<vmem>>, vector<25x28xf32>
    %cst_24 = arith.constant dense<0.000000e+00> : vector<8x28xf32>
    %25 = tpu.matmul %21, %24, %cst_24 {dimension_numbers = #tpu.dot_dimension_numbers<[1], [0], [0], [1], [0, 0, 1, 1], [], []>} : vector<8x25xf32>, vector<25x28xf32>, vector<8x28xf32> -> vector<8x28xf32>
    %26 = arith.addf %23, %25 : vector<8x28xf32>
    %c0_25 = arith.constant 0 : index
    %c0_26 = arith.constant 0 : index
    %27 = vector.load %arg10[%c0_25, %c0_26] : memref<1x28xf32, #tpu.memory_space<vmem>>, vector<1x28xf32>
    %28 = vector.broadcast %27 : vector<1x28xf32> to vector<8x28xf32>
    %29 = arith.addf %26, %28 : vector<8x28xf32>
    %cst_27 = arith.constant 0.000000e+00 : f32
    %30 = vector.broadcast %cst_27 : f32 to vector<8x28xf32>
    %31 = arith.cmpf ogt, %29, %30 : vector<8x28xf32>
    %cst_28 = arith.constant 0.00999999977 : f32
    %32 = vector.broadcast %cst_28 : f32 to vector<8x28xf32>
    %33 = arith.mulf %32, %29 : vector<8x28xf32>
    %34 = arith.select %31, %29, %33 : vector<8x28xi1>, vector<8x28xf32>
    %c0_29 = arith.constant 0 : index
    %c0_30 = arith.constant 0 : index
    %35 = vector.load %arg11[%c0_29, %c0_30] : memref<28x1xf32, #tpu.memory_space<vmem>>, vector<28x1xf32>
    %cst_31 = arith.constant dense<0.000000e+00> : vector<8x1xf32>
    %36 = tpu.matmul %34, %35, %cst_31 {dimension_numbers = #tpu.dot_dimension_numbers<[1], [0], [0], [1], [0, 0, 1, 1], [], []>} : vector<8x28xf32>, vector<28x1xf32>, vector<8x1xf32> -> vector<8x1xf32>
    %c0_32 = arith.constant 0 : index
    %37 = memref.load %arg12[%c0_32] : memref<1xf32, #tpu.memory_space<smem>>
    %38 = vector.broadcast %37 : f32 to vector<8x1xf32>
    %39 = arith.addf %36, %38 : vector<8x1xf32>
    %40 = arith.negf %39 : vector<8x1xf32>
    %41 = math.exp %40 : vector<8x1xf32>
    %cst_33 = arith.constant 1.000000e+00 : f32
    %42 = vector.broadcast %cst_33 : f32 to vector<8x1xf32>
    %43 = arith.addf %42, %41 : vector<8x1xf32>
    %44 = arith.divf %42, %43 : vector<8x1xf32>
    %c0_34 = arith.constant 0 : index
    %c0_35 = arith.constant 0 : index
    %45 = vector.load %arg13[%c0_34, %c0_35] : memref<8x1xf32, #tpu.memory_space<vmem>>, vector<8x1xf32>
    tpu.vector_store %arg13[%c0_34, %c0_35], %44 {strides = array<i32>} : memref<8x1xf32, #tpu.memory_space<vmem>>, vector<8x1xf32>,
    return
  }
  func.func @transform_0(%arg0: i32) -> (i32, i32) {
    %c0_i32 = arith.constant 0 : i32
    %c0_i32_0 = arith.constant 0 : i32
    return %arg0, %c0_i32 : i32, i32
  }
  func.func @transform_1(%arg0: i32) -> (i32, i32) {
    %c0_i32 = arith.constant 0 : i32
    %c0_i32_0 = arith.constant 0 : i32
    %c0_i32_1 = arith.constant 0 : i32
    return %c0_i32, %c0_i32_0 : i32, i32
  }
  func.func @transform_2(%arg0: i32) -> (i32, i32) {
    %c0_i32 = arith.constant 0 : i32
    %c0_i32_0 = arith.constant 0 : i32
    %c0_i32_1 = arith.constant 0 : i32
    return %c0_i32, %c0_i32_0 : i32, i32
  }
  func.func @transform_3(%arg0: i32) -> (i32, i32) {
    %c0_i32 = arith.constant 0 : i32
    %c0_i32_0 = arith.constant 0 : i32
    %c0_i32_1 = arith.constant 0 : i32
    return %c0_i32, %c0_i32_0 : i32, i32
  }
  func.func @transform_4(%arg0: i32) -> (i32, i32) {
    %c0_i32 = arith.constant 0 : i32
    %c0_i32_0 = arith.constant 0 : i32
    %c0_i32_1 = arith.constant 0 : i32
    return %c0_i32, %c0_i32_0 : i32, i32
  }
  func.func @transform_5(%arg0: i32) -> (i32, i32) {
    %c0_i32 = arith.constant 0 : i32
    %c0_i32_0 = arith.constant 0 : i32
    %c0_i32_1 = arith.constant 0 : i32
    return %c0_i32, %c0_i32_0 : i32, i32
  }
  func.func @transform_6(%arg0: i32) -> (i32, i32) {
    %c0_i32 = arith.constant 0 : i32
    %c0_i32_0 = arith.constant 0 : i32
    %c0_i32_1 = arith.constant 0 : i32
    return %c0_i32, %c0_i32_0 : i32, i32
  }
  func.func @transform_7(%arg0: i32) -> (i32, i32) {
    %c0_i32 = arith.constant 0 : i32
    %c0_i32_0 = arith.constant 0 : i32
    %c0_i32_1 = arith.constant 0 : i32
    return %c0_i32, %c0_i32_0 : i32, i32
  }
  func.func @transform_8(%arg0: i32) -> (i32, i32) {
    %c0_i32 = arith.constant 0 : i32
    %c0_i32_0 = arith.constant 0 : i32
    %c0_i32_1 = arith.constant 0 : i32
    return %c0_i32, %c0_i32_0 : i32, i32
  }
  func.func @transform_9(%arg0: i32) -> (i32, i32) {
    %c0_i32 = arith.constant 0 : i32
    %c0_i32_0 = arith.constant 0 : i32
    %c0_i32_1 = arith.constant 0 : i32
    return %c0_i32, %c0_i32_0 : i32, i32
  }
  func.func @transform_10(%arg0: i32) -> (i32, i32) {
    %c0_i32 = arith.constant 0 : i32
    %c0_i32_0 = arith.constant 0 : i32
    %c0_i32_1 = arith.constant 0 : i32
    return %c0_i32, %c0_i32_0 : i32, i32
  }
  func.func @transform_11(%arg0: i32) -> i32 {
    %c0_i32 = arith.constant 0 : i32
    %c0_i32_0 = arith.constant 0 : i32
    return %c0_i32 : i32
  }
  func.func @transform_12(%arg0: i32) -> (i32, i32) {
    %c0_i32 = arith.constant 0 : i32
    %c0_i32_0 = arith.constant 0 : i32
    return %arg0, %c0_i32 : i32, i32
  }
}

</mosaic_0001>

<bundles_post_ra>
// kernel: tpu_custom_call.1
= control target key start
LH: loop header
LB: loop body
LE: loop exit
PB: predicated region body
PF: predicated region fallthrough
CT: control target
= control target key end

     0   :  { %18 = vsyncpa [#allocation4], 0  ;;  %s1311_s0 = inlined_call_operand.hbm [shape: f32[8,18], index: 0, kind: input, shape index: {}]   ;;  %s1312_s1 = inlined_call_operand.hbm [shape: f32[18,32], index: 1, kind: input, shape index: {}]   ;;  %s1313_s2 = inlined_call_operand.vmem [shape: f32[1,32], index: 2, kind: input, shape index: {}]   ;;  %s1314_s3 = inlined_call_operand.vmem [shape: f32[32,100], index: 3, kind: input, shape index: {}]   ;;  %s1315_s4 = inlined_call_operand.vmem [shape: f32[32,100], index: 4, kind: input, shape index: {}]   ;;  %s1316_s5 = inlined_call_operand.vmem [shape: f32[32,25], index: 5, kind: input, shape index: {}]   ;;  %s1317_s6 = inlined_call_operand.vmem [shape: f32[100,25], index: 6, kind: input, shape index: {}]   ;;  %s1318_s7 = inlined_call_operand.vmem [shape: f32[32,28], index: 7, kind: input, shape index: {}]   ;;  %s1319_s8 = inlined_call_operand.vmem [shape: f32[25,28], index: 8, kind: input, shape index: {}]   ;;  %s1320_s9 = inlined_call_operand.vmem [shape: f32[1,28], index: 9, kind: input, shape index: {}]   ;;  %s1321_s10 = inlined_call_operand.vmem [shape: f32[28,1], index: 10, kind: input, shape index: {}]   ;;  %s1322_s11 = inlined_call_operand.<no memory space> [shape: f32[1], index: 11, kind: input, shape index: {}]   ;;  %s1323_s12 = inlined_call_operand.vmem [shape: f32[8,1], index: 12, kind: output, shape index: {}]  }
   0x1   :  { %19 = vsyncpa [#allocation6], 0  ;;  %s1032_s21 = smov [#allocation3]   ;;  %s1033_s23 = smov [#allocation5]  }
   0x2   :  { %s26_s22 = sshll.u32 %s1032_s21, 4  ;;  %s35_s24 = sshll.u32 %s1033_s23, 4  ;;  %s27_s22 = int_to_ptr.vmem [resolvable:$true] %s26_s22  ;;  %s1105_s24 = int_to_ptr.vmem [resolvable:$true] %s35_s24 }
   0x3   :  { %s984_s27 = scalar_lea.hbm %s1311_s0, 128 }
   0x4   :  { %p985_p0 = scmp.ne.s32.totalorder %s1311_s0, %s984_s27  ;;  %p988_p1 = scmp.lt.u32.totalorder %s984_s27, %s1311_s0 }
   0x6   :  { %p990_p2 = pnand %p988_p1, %p985_p0 }
   0x8   :  { %993 = shalt.err (!%p990_p2)
}
   0x9   :  { %s994_s14 = scalar_lea.vmem %s27_s22, 128  ;;  %p999_p4 = scmp.lt.s32.totalorder %s27_s22, %s27_s22 }
   0xa   :  { %p995_p3 = scmp.ne.s32.totalorder %s27_s22, %s994_s14  ;;  %p1000_p5 = scmp.lt.s32.totalorder %s994_s14, %s994_s14 }
   0xc   :  { %p1001_p6 = por %p1000_p5, %p999_p4 }
   0xe   :  { %p1002_p7 = pnand %p1001_p6, %p995_p3 }
  0x10   :  { %1005 = shalt.err (!%p1002_p7)
}
  0x11   :  { %29 = dma.hbm_to_vmem [thread:$0]  %s1311_s0, 128, %s27_s22, [#allocation4]  }
  0x12   :  { %s1006_s19 = scalar_lea.hbm %s1312_s1, 384 }
  0x13   :  { %p1007_p8 = scmp.ne.s32.totalorder %s1312_s1, %s1006_s19  ;;  %p1010_p9 = scmp.lt.u32.totalorder %s1006_s19, %s1312_s1 }
  0x15   :  { %p1012_p10 = pnand %p1010_p9, %p1007_p8 }
  0x17   :  { %1015 = shalt.err (!%p1012_p10)
}
  0x18   :  { %s1016_s26 = scalar_lea.vmem %s1105_s24, 384  ;;  %p1021_p12 = scmp.lt.s32.totalorder %s1105_s24, %s1105_s24 }
  0x19   :  { %p1017_p11 = scmp.ne.s32.totalorder %s1105_s24, %s1016_s26  ;;  %p1022_p13 = scmp.lt.s32.totalorder %s1016_s26, %s1016_s26 }
  0x1b   :  { %p1023_p0 = por %p1022_p13, %p1021_p12 }
  0x1d   :  { %p1024_p1 = pnand %p1023_p0, %p1017_p11 }
  0x1f   :  { %1027 = shalt.err (!%p1024_p1)
}
  0x20   :  { %s1034_s0 = smov 128   ;;  %s1035_s22 = smov 8  }
  0x21   :  { %41 = dma.hbm_to_vmem [thread:$0]  %s1312_s1, 384, %s1105_s24, [#allocation6], %s1034_s0, %s1034_s0, %s1035_s22  }
  0x22   :  { %1028 = dma.done.wait [#allocation4], 128  }
  0x23   :  { %1029 = vsyncadd [#allocation4], 4294967168 }
  0x24   :  { %1030 = dma.done.wait [#allocation6], 384  }
  0x25   :  { %1031 = vsyncadd [#allocation6], 4294966912  ;;  %v1036_v0 = vmov 0.0|0.0   ;;  %vm1037_vm0 = vmmov 0   ;;  %v1038_v1 = vmov 0.0   ;;  %v69_v2 = vld [vmem:[#allocation5] sm:$0xff] }
  0x26   :  { %913 = vmatprep.subr.bf16.mxu0 %v1036_v0  ;;  %815 = vmatprep.mubr.msk.f32.mxu0 %vm1037_vm0, %v1038_v1  ;;  %v70_v3 = vld [vmem:[#allocation5 + $0x8] sm:$0xff]  ;;  %v158_v5 = vld [vmem:[%s1314_s3] sm:$0xff]  ;;  %v159_v6 = vld [vmem:[%s1314_s3 + $0x8] sm:$0xff]  ;;  %vm83_vm1 = vcmask 1041408   ;;  %vm79_vm2 = vcmask 146432   ;;  %vm162_vm3 = vcmask 261120  }
  0x27   :  { %916 = vmatprep.subr.bf16.mxu1 %v1036_v0  ;;  %826 = vmatprep.mubr.msk.f32.mxu1 %vm1037_vm0, %v1038_v1  ;;  %v914_v4 = vpack.c.bf16 %v70_v3, %v69_v2  ;;  %v917_v7 = vpack.c.bf16 %v159_v6, %v158_v5  ;;  %v237_v8 = vld [vmem:[%s1315_s4] sm:$0xff]  ;;  %v238_v9 = vld [vmem:[%s1315_s4 + $0x8] sm:$0xff]  ;;  %v71_v10 = vld [vmem:[#allocation5 + $0x10] sm:$0x3]  ;;  %vm337_vm4 = vcmask 1043456   ;;  %vm333_vm5 = vcmask 818176  }
  0x28   :  { %v68_v11 = vld [vmem:[#allocation3] sm:$0xff]  ;;  %v923_v12 = vpack.c.bf16 %v238_v9, %v237_v8  ;;  %v160_v13 = vld [vmem:[%s1314_s3 + $0x10] sm:$0xff]  ;;  %v161_v14 = vld [vmem:[%s1314_s3 + $0x18] sm:$0xff]  ;;  %vm494_vm6 = vcmask 1040384   ;;  %vm1039_vm7 = vmmov 1   ;;  %vm490_vm9 = vcmask 203776  }
  0x29   :  { %915 = vmatpush3.bf16.msra.mxu0 %v914_v4  ;;  %918 = vmatpush3.bf16.msra.mxu1 %v917_v7  ;;  %v920_v15 = vpack.c.bf16 %v161_v14, %v160_v13  ;;  %v239_v16 = vld [vmem:[%s1315_s4 + $0x10] sm:$0xff]  ;;  %v240_v17 = vld [vmem:[%s1315_s4 + $0x18] sm:$0xff]  ;;  %v746_v19 = vld [vmem:[%s1313_s2] ss:$0 sm:$0xff]  ;;  %vm655_vm12 = vcmask 228352   ;;  %vm738_vm13 = vcmask 7168  }
  0x2a   :  { %813 = vmatprep.subr.mxu0 %v1038_v1  ;;  %919 = vmatprep.subr.bf16.mxu1 %v1036_v0  ;;  %v926_v18 = vpack.c.bf16 %v240_v17, %v239_v16  ;;  %v320_v20 = vld [vmem:[%s1317_s6] sm:$0xff]  ;;  %v321_v21 = vld [vmem:[%s1317_s6 + $0x8] sm:$0xff]  ;;  %v322_v29 = vld [vmem:[%s1317_s6 + $0x10] sm:$0xff] }
  0x2b   :  { %v314_v25 = vld [vmem:[%s1316_s5] sm:$0xff]  ;;  %v315_v26 = vld [vmem:[%s1316_s5 + $0x8] sm:$0xff]  ;;  %v929_v27 = vpack.c.bf16 %v321_v21, %v320_v20  ;;  %v323_v30 = vld [vmem:[%s1317_s6 + $0x18] sm:$0xff] }
  0x2c   :  { %v947_v31 = vpack.c.bf16 %v315_v26, %v314_v25  ;;  %v316_v33 = vld [vmem:[%s1316_s5 + $0x10] sm:$0xff]  ;;  %v317_v34 = vld [vmem:[%s1316_s5 + $0x18] sm:$0xff]  ;;  %v932_v35 = vpack.c.bf16 %v323_v30, %v322_v29  ;;  %v324_v36 = vld [vmem:[%s1317_s6 + $0x20] sm:$0xff]  ;;  %v654_v25 = vstv %s1322_s11 }
  0x2d   :  { %814 = vmatpush3.msk.msra.mxu0 %vm83_vm1, %v71_v10  ;;  %921 = vmatpush3.bf16.msra.mxu1 %v920_v15  ;;  %v325_v37 = vld [vmem:[%s1317_s6 + $0x28] sm:$0xff]  ;;  %v950_v38 = vpack.c.bf16 %v317_v34, %v316_v33  ;;  %v326_v40 = vld [vmem:[%s1317_s6 + $0x30] sm:$0xff]  ;;  %v327_v41 = vld [vmem:[%s1317_s6 + $0x38] sm:$0xff] }
  0x2e   :  { %816 = vmatmul.mubr.msk.f32.vlgmr.msra.gmra.mrb[0].mxu0 %vm79_vm2, %v68_v11  ;;  %922 = vmatprep.subr.bf16.mxu0 %v1036_v0  ;;  %v935_v39 = vpack.c.bf16 %v325_v37, %v324_v36  ;;  %v938_v42 = vpack.c.bf16 %v327_v41, %v326_v40  ;;  %v328_v43 = vld [vmem:[%s1317_s6 + $0x40] sm:$0xff]  ;;  %v329_v44 = vld [vmem:[%s1317_s6 + $0x48] sm:$0xff]  ;;  %v330_v46 = vld [vmem:[%s1317_s6 + $0x50] sm:$0xff] }
  0x2f   :  { %924 = vmatpush3.bf16.msra.mxu0 %v923_v12  ;;  %837 = vmatprep.mubr.msk.f32.mxu0 %vm1037_vm0, %v1038_v1  ;;  %v941_v45 = vpack.c.bf16 %v329_v44, %v328_v43  ;;  %v331_v47 = vld [vmem:[%s1317_s6 + $0x58] sm:$0xff]  ;;  %v332_v49 = vld [vmem:[%s1317_s6 + $0x60] sm:$0xf]  ;;  %v487_v51 = vld [vmem:[%s1319_s8 + $0x8] sm:$0xff] }
  0x30   :  { %925 = vmatprep.subr.bf16.mxu0 %v1036_v0  ;;  %928 = vmatprep.subr.bf16.mxu1 %v1036_v0  ;;  %v944_v48 = vpack.c.bf16 %v331_v47, %v330_v46  ;;  %v486_v50 = vld [vmem:[%s1319_s8] sm:$0xff]  ;;  %v488_v61 = vld [vmem:[%s1319_s8 + $0x10] sm:$0xff]  ;;  %v489_v62 = vld [vmem:[%s1319_s8 + $0x18] sm:$0x1] }
  0x31   :  { %v953_v52 = vpack.c.bf16 %v487_v51, %v486_v50  ;;  %v956_v63 = vpack.c.bf16 %v489_v62, %v488_v61  ;;  %vm957_vm8 = vmpackc.low %vm494_vm6, %vm1039_vm7  ;;  %v482_v2 = vld [vmem:[%s1318_s7] sm:$0xff]  ;;  %v483_v3 = vld [vmem:[%s1318_s7 + $0x8] sm:$0xff] }
  0x32   :  { %v960_v7 = vpack.c.bf16 %v483_v3, %v482_v2  ;;  %v484_v9 = vld [vmem:[%s1318_s7 + $0x10] sm:$0xff]  ;;  %v485_v10 = vld [vmem:[%s1318_s7 + $0x18] sm:$0xff]  ;;  %v649_v12 = vld [vmem:[%s1321_s10] sm:$0xff] }
  0x33   :  { %927 = vmatpush3.bf16.msra.mxu0 %v926_v18  ;;  %v963_v11 = vpack.c.bf16 %v485_v10, %v484_v9  ;;  %v650_v13 = vld [vmem:[%s1321_s10 + $0x8] sm:$0xff]  ;;  %v652_v15 = vld [vmem:[%s1321_s10 + $0x18] sm:$0xf]  ;;  %vm970_vm10 = vmpackc.low %vm337_vm4, %vm1039_vm7 }
  0x34   :  { %946 = vmatprep.subr.bf16.mxu0 %v1036_v0  ;;  %v966_v14 = vpack.c.bf16 %v650_v13, %v649_v12 }
 0x101   :  { %v153_v22 = vpop.f32.mrb[0].mxu0 }
 0x102   :  { %v154_v23 = vadd.f32 %v746_v19, %v153_v22  ;;  %v817_v24 = vpop.f32.mrb[1].mxu0 }
 0x104   :  { %v1189_v28 = vmax.f32 %v154_v23, 0.0 }
 0x106   :  { %v236_v32 = vmul.f32 %v1189_v28, %v1189_v28  ;;  %827 = vmatmul.mubr.msk.f32.vlgmr.msra.gmra.mrb[0].mxu1 %vm162_vm3, %v1189_v28 }
 0x107   :  { %930 = vmatpush3.bf16.msra.mxu1 %v929_v27  ;;  %866 = vmatprep.mubr.msk.f32.mxu1 %vm1037_vm0, %v1038_v1 }
 0x108   :  { %838 = vmatmul.mubr.msk.f32.vlgmr.msra.gmra.mrb[2].mxu0 %vm162_vm3, %v236_v32  ;;  %931 = vmatprep.subr.bf16.mxu1 %v1036_v0 }
 0x109   :  { %948 = vmatpush3.bf16.msra.mxu0 %v947_v31  ;;  %877 = vmatprep.mubr.msk.f32.mxu0 %vm1037_vm0, %v1038_v1 }
 0x10a   :  { %949 = vmatprep.subr.bf16.mxu0 %v1036_v0 }
 0x10b   :  { %933 = vmatpush3.bf16.msra.mxu1 %v932_v35 }
 0x10c   :  { %934 = vmatprep.subr.bf16.mxu1 %v1036_v0 }
 0x10d   :  { %951 = vmatpush3.bf16.msra.mxu0 %v950_v38 }
 0x10e   :  { %952 = vmatprep.subr.bf16.mxu0 %v1036_v0 }
 0x10f   :  { %936 = vmatpush3.bf16.msra.mxu1 %v935_v39 }
 0x110   :  { %878 = vmatmul.mubr.msk.f32.vlgmr.msra.gmra.mrb[4].mxu0 %vm162_vm3, %v1189_v28  ;;  %937 = vmatprep.subr.bf16.mxu1 %v1036_v0 }
 0x111   :  { %888 = vmatprep.mubr.msk.f32.mxu0 %vm1037_vm0, %v1038_v1  ;;  %954 = vmatpush3.bf16.msra.mxu0 %v953_v52 }
 0x112   :  { %955 = vmatprep.subr.bf16.mxu0 %v1036_v0 }
 0x113   :  { %939 = vmatpush3.bf16.msra.mxu1 %v938_v42 }
 0x114   :  { %940 = vmatprep.subr.bf16.mxu1 %v1036_v0 }
 0x115   :  { %958 = vmatpush3.bf16.msk.msra.mxu0 %vm957_vm8, %v956_v63 }
 0x116   :  { %959 = vmatprep.subr.bf16.mxu0 %v1036_v0 }
 0x117   :  { %942 = vmatpush3.bf16.msra.mxu1 %v941_v45 }
 0x118   :  { %943 = vmatprep.subr.bf16.mxu1 %v1036_v0 }
 0x11b   :  { %945 = vmatpush3.bf16.msra.mxu1 %v944_v48 }
 0x11c   :  { %864 = vmatprep.subr.mxu1 %v1038_v1 }
 0x11f   :  { %865 = vmatpush3.msk.msra.mxu1 %vm337_vm4, %v332_v49 }
 0x120   :  { %965 = vmatprep.subr.bf16.mxu1 %v1036_v0 }
 0x1d9   :  { %v232_v53 = vpop.f32.mrb[0].mxu1 }
 0x1da   :  { %v318_v54 = vmul.f32 %v232_v53, %v232_v53  ;;  %v828_v55 = vpop.f32.mrb[1].mxu1 }
 0x1db   :  { %v310_v56 = vpop.f32.mrb[2].mxu0 }
 0x1dc   :  { %v319_v57 = vsub.f32 %v318_v54, %v310_v56  ;;  %v839_v58 = vpop.f32.mrb[3].mxu0 }
 0x1de   :  { %867 = vmatmul.mubr.msk.f32.vlgmr.msra.gmra.mrb[2].mxu1 %vm333_vm5, %v319_v57 }
 0x1df   :  { %910 = vmatprep.mubr.msk.f32.mxu1 %vm1037_vm0, %v1038_v1  ;;  %967 = vmatpush3.bf16.msra.mxu1 %v966_v14 }
 0x1e0   :  { %968 = vmatprep.subr.bf16.mxu1 %v1036_v0 }
 0x1e3   :  { %v478_v59 = vpop.f32.mrb[4].mxu0 }
 0x1e4   :  { %v879_v60 = vpop.f32.mrb[5].mxu0 }
 0x2b1   :  { %v407_v4 = vpop.f32.mrb[2].mxu1 }
 0x2b2   :  { %v411_v5 = vmul.f32 0.5, %v407_v4  ;;  %v868_v6 = vpop.f32.mrb[3].mxu1 }
 0x2b4   :  { %v479_v8 = vadd.f32 %v478_v59, %v411_v5 }
 0x2b6   :  { %889 = vmatmul.mubr.msk.f32.vlgmr.msra.gmra.mrb[6].mxu0 %vm490_vm9, %v479_v8 }
 0x2b7   :  { %961 = vmatpush3.bf16.msra.mxu0 %v960_v7  ;;  %899 = vmatprep.mubr.msk.f32.mxu0 %vm1037_vm0, %v1038_v1  ;;  %v651_v1 = vld [vmem:[%s1321_s10 + $0x10] sm:$0xff] }
 0x2b8   :  { %962 = vmatprep.subr.bf16.mxu0 %v1036_v0  ;;  %v969_v16 = vpack.c.bf16 %v652_v15, %v651_v1  ;;  %v757_v0 = vld [vmem:[%s1320_s9] ss:$0 sm:$0xff] }
 0x2ba   :  { %971 = vmatpush3.bf16.msk.msra.mxu1 %vm970_vm10, %v969_v16 }
 0x2bb   :  { %964 = vmatpush3.bf16.msra.mxu0 %v963_v11 }
 0x2be   :  { %900 = vmatmul.mubr.msk.f32.vlgmr.msra.gmra.mrb[8].mxu0 %vm162_vm3, %v1189_v28 }
 0x389   :  { %v564_v17 = vpop.f32.mrb[6].mxu0 }
 0x38a   :  { %v890_v18 = vpop.f32.mrb[7].mxu0 }
 0x391   :  { %v634_v19 = vpop.f32.mrb[8].mxu0 }
 0x392   :  { %v635_v20 = vadd.f32 %v634_v19, %v564_v17  ;;  %v901_v21 = vpop.f32.mrb[9].mxu0 }
 0x394   :  { %v645_v22 = vadd.f32 %v757_v0, %v635_v20 }
 0x396   :  { %vm646_vm11 = vcmp.gt.f32.partialorder %v645_v22, 0.0  ;;  %v647_v23 = vmul.f32 0.01, %v645_v22 }
 0x398   :  { %v648_v24 = vsel %vm646_vm11, %v645_v22, %v647_v23 }
 0x399   :  { %911 = vmatmul.mubr.msk.f32.vlgmr.msra.gmra.mrb[4].mxu1 %vm655_vm12, %v648_v24 }
 0x46c   :  { %v728_v26 = vpop.f32.mrb[4].mxu1 }
 0x46d   :  { %v729_v27 = vadd.f32 %v728_v26, %v654_v25  ;;  %v912_v28 = vpop.f32.mrb[5].mxu1 }
 0x46f   :  { %v760_v29 = vmul.f32 -1.442695, %v729_v27 }
 0x471   :  { %980 = vpow2.f32 %v760_v29 }
 0x47b   :  { %v981_v30 = vpop.eup %980 }
 0x47c   :  { %v735_v31 = vadd.f32 1.0, %v981_v30 }
 0x47e   :  { %982 = vrcp.f32 %v735_v31 }
 0x488   :  { %v983_v32 = vpop.eup %982 }
 0x489   :  { %739 = vst.msk [vmem:[%s1323_s12] sm:$0xff] %vm738_vm13, %v983_v32 }
 0x48a   :  { %744 = vsyncpa [#allocation4], 1 }
 0x48b   :  { %745 = vsyncpa [#allocation6], 1 }

</bundles_post_ra>
